<compile_context>
chip_gen: v6e
topology: v6e:2x2x1
jax: 0.10.0
libtpu: 0.0.40
codegen_flags: <defaults>
</compile_context>

<pallas_src>
import functools

import jax
import jax.numpy as jnp
from jax import lax
from jax.experimental import pallas as pl
from jax.experimental.pallas import tpu as pltpu

EPS = 1e-05


def layernorm_kernel(x_ref, w_ref, b_ref, o_ref, *, inv_c, eps):
    # x_ref: (bB, C, tT)   w_ref / b_ref: (1, C, 1)   o_ref: (bB, C, tT)
    x = x_ref[...].astype(jnp.float32)

    # Two-pass moments over C (f32 accumulation) — same math as PyTorch ref.
    mu = jnp.sum(x, axis=1, keepdims=True) * inv_c            # (bB, 1, tT)
    res = x - mu
    var = jnp.sum(res * res, axis=1, keepdims=True) * inv_c   # (bB, 1, tT)
    inv = lax.rsqrt(var + eps)                                # EUP op (own slot)

    w = w_ref[...].astype(jnp.float32)                        # (1, C, 1)
    b = b_ref[...].astype(jnp.float32)
    o_ref[...] = (res * inv * w + b).astype(o_ref.dtype)      # per-channel affine


def _vmem_limit_bytes():
    """Generation-specific VMEM scoped limit (~75% of physical per-TC VMEM)."""
    try:
        cap = int(pltpu.get_tpu_info().vmem_capacity_bytes)
    except Exception:
        cap = 64 * 1024 * 1024          # conservative (v7x per-TC) fallback
    return min(int(cap * 0.75), 112 * 1024 * 1024)


def _choose_blocks(B, C, T, itemsize, vmem_limit):
    """Pick (bB, t_tile): multi-MiB data blocks that fit VMEM with headroom."""
    # Per-element VMEM footprint across the pipeline:
    #   2x input + 2x output double-buffered tiles (input dtype)
    #   ~3x f32 intermediates inside the body (x_f32, residual, f32 out).
    bytes_per_elem = 4 * itemsize + 3 * 4
    headroom = 4 * 1024 * 1024
    max_block_elems = max(8 * 128, (vmem_limit - headroom) // bytes_per_elem)

    # Target ~4 MiB of real data per block (per-step overhead < ~1%), clipped
    # by the VMEM-derived element cap.
    target_elems = min(max_block_elems, (4 * 1024 * 1024) // itemsize)

    per_batch = C * T
    if per_batch <= target_elems:
        # Thin tensor: keep T whole and fold batches into the block.
        bB = max(1, min(B, target_elems // per_batch))
        if B > 1:
            bB = min(bB, max(1, B // 2))   # keep >= 2 grid steps for megacore
        return bB, T

    # Per-batch slab already big: tile T into lane-dense 128-multiples.
    if T < 128:
        return 1, T                        # tiny ragged T: full-extent lanes
    max_t = max(128, ((min(max_block_elems, target_elems) // C) // 128) * 128)
    t128 = (T // 128) * 128
    t_tile = min(t128, max_t)
    # Prefer a tile dividing the 128-aligned portion of T (fewer masked blocks).
    while t128 % t_tile != 0 and t_tile > 128:
        t_tile -= 128
    return 1, t_tile


def layer_norm_bct(x, weight, bias, *, eps=EPS):
    """x: (B, C, T); weight, bias: (1, C, 1). Normalizes over C (dim=1)."""
    assert x.ndim == 3
    B, C, T = x.shape
    assert weight.shape == (1, C, 1) and bias.shape == (1, C, 1)

    itemsize = jnp.dtype(x.dtype).itemsize
    vmem_limit = _vmem_limit_bytes()
    bB, t_tile = _choose_blocks(B, C, T, itemsize, vmem_limit)
    n_b = pl.cdiv(B, bB)
    n_t = pl.cdiv(T, t_tile)

    kernel = functools.partial(layernorm_kernel, inv_c=1.0 / C, eps=eps)

    param_itemsize = jnp.dtype(weight.dtype).itemsize
    cost = pl.CostEstimate(
        flops=8 * B * C * T,
        transcendentals=B * T,
        bytes_accessed=2 * B * C * T * itemsize + 2 * C * param_itemsize,
    )

    # Deepen the input pipeline only when blocks are unavoidably small and the
    # grid is long enough for a 3-deep buffer to matter.
    blk_bytes = bB * C * t_tile * itemsize
    x_spec_kwargs = {}
    if blk_bytes < (1 << 20) and (n_b * n_t) >= 4:
        x_spec_kwargs["pipeline_mode"] = pl.Buffered(3)

    x_spec = pl.BlockSpec((bB, C, t_tile), lambda ib, it: (ib, 0, it),
                          **x_spec_kwargs)
    param_spec = pl.BlockSpec((1, C, 1), lambda ib, it: (0, 0, 0))
    out_spec = pl.BlockSpec((bB, C, t_tile), lambda ib, it: (ib, 0, it))

    return pl.pallas_call(
        kernel,
        out_shape=jax.ShapeDtypeStruct((B, C, T), x.dtype),
        grid_spec=pltpu.PrefetchScalarGridSpec(
            num_scalar_prefetch=0,
            grid=(n_b, n_t),
            in_specs=[x_spec, param_spec, param_spec],
            out_specs=out_spec,
        ),
        compiler_params=pltpu.CompilerParams(
            dimension_semantics=("parallel", "parallel"),
            vmem_limit_bytes=vmem_limit,
        ),
        cost_estimate=cost,
    )(x, weight, bias)


if __name__ == "__main__":
    B, C, T = 2, 8, 256
    key = jax.random.PRNGKey(0)
    x = jax.random.normal(key, (B, C, T), dtype=jnp.float32)

    # Parameters exactly as the module's __init__ (affine=True): ones / zeros.
    weight = jnp.ones((1, C, 1), dtype=jnp.float32)
    bias = jnp.zeros((1, C, 1), dtype=jnp.float32)

    out = jax.block_until_ready(layer_norm_bct(x, weight, bias))

    # Pure-JAX reference (same math as the PyTorch forward).
    mu = jnp.mean(x, axis=1, keepdims=True)
    res = x - mu
    sigma = jnp.mean(res * res, axis=1, keepdims=True)
    ref = res / jnp.sqrt(sigma + EPS) * weight + bias
    assert jnp.allclose(out, ref, atol=1e-4, rtol=1e-5), (
        float(jnp.max(jnp.abs(out - ref)))
    )

    print("KERNEL_OK")
</pallas_src>

<mosaic_0001>
module attributes {stable_mosaic.version = 11 : i64} {
  func.func @layernorm_kernel(%arg0: i32, %arg1: i32, %arg2: memref<1x8x256xf32, #tpu.memory_space<vmem>>, %arg3: memref<1x8x1xf32, #tpu.memory_space<vmem>>, %arg4: memref<1x8x1xf32, #tpu.memory_space<vmem>>, %arg5: memref<1x8x256xf32, #tpu.memory_space<vmem>>) attributes {dimension_semantics = [#tpu.dimension_semantics<parallel>, #tpu.dimension_semantics<parallel>], iteration_bounds = array<i64: 2, 1>, scalar_prefetch = 0 : i64, scratch_operands = 0 : i64, tpu.core_type = #tpu.core_type<tc>, window_params = [{transform_indices = @transform_0, window_bounds = array<i64: 1, 8, 256>}, {pipeline_mode = #tpu.pipeline_mode<synchronous>, transform_indices = @transform_1, window_bounds = array<i64: 1, 8, 1>}, {pipeline_mode = #tpu.pipeline_mode<synchronous>, transform_indices = @transform_2, window_bounds = array<i64: 1, 8, 1>}, {transform_indices = @transform_3, window_bounds = array<i64: 1, 8, 256>}]} {
    %c0 = arith.constant 0 : index
    %c0_0 = arith.constant 0 : index
    %c0_1 = arith.constant 0 : index
    %0 = vector.load %arg2[%c0, %c0_0, %c0_1] : memref<1x8x256xf32, #tpu.memory_space<vmem>>, vector<1x8x256xf32>
    %cst = arith.constant dense<0.000000e+00> : vector<1x256xf32>
    %1 = vector.multi_reduction <add>, %0, %cst [1] : vector<1x8x256xf32> to vector<1x256xf32>
    %2 = vector.shape_cast %1 : vector<1x256xf32> to vector<1x1x256xf32>
    %cst_2 = arith.constant 1.250000e-01 : f32
    %3 = vector.broadcast %cst_2 : f32 to vector<1x1x256xf32>
    %4 = arith.mulf %2, %3 : vector<1x1x256xf32>
    %5 = vector.broadcast %4 : vector<1x1x256xf32> to vector<1x8x256xf32>
    %6 = arith.subf %0, %5 : vector<1x8x256xf32>
    %7 = arith.mulf %6, %6 : vector<1x8x256xf32>
    %cst_3 = arith.constant dense<0.000000e+00> : vector<1x256xf32>
    %8 = vector.multi_reduction <add>, %7, %cst_3 [1] : vector<1x8x256xf32> to vector<1x256xf32>
    %9 = vector.shape_cast %8 : vector<1x256xf32> to vector<1x1x256xf32>
    %cst_4 = arith.constant 1.250000e-01 : f32
    %10 = vector.broadcast %cst_4 : f32 to vector<1x1x256xf32>
    %11 = arith.mulf %9, %10 : vector<1x1x256xf32>
    %cst_5 = arith.constant 9.99999974E-6 : f32
    %12 = vector.broadcast %cst_5 : f32 to vector<1x1x256xf32>
    %13 = arith.addf %11, %12 : vector<1x1x256xf32>
    %14 = math.rsqrt %13 : vector<1x1x256xf32>
    %c0_6 = arith.constant 0 : index
    %c0_7 = arith.constant 0 : index
    %c0_8 = arith.constant 0 : index
    %15 = vector.load %arg3[%c0_6, %c0_7, %c0_8] : memref<1x8x1xf32, #tpu.memory_space<vmem>>, vector<1x8x1xf32>
    %c0_9 = arith.constant 0 : index
    %c0_10 = arith.constant 0 : index
    %c0_11 = arith.constant 0 : index
    %16 = vector.load %arg4[%c0_9, %c0_10, %c0_11] : memref<1x8x1xf32, #tpu.memory_space<vmem>>, vector<1x8x1xf32>
    %17 = vector.broadcast %14 : vector<1x1x256xf32> to vector<1x8x256xf32>
    %18 = arith.mulf %6, %17 : vector<1x8x256xf32>
    %19 = vector.broadcast %15 : vector<1x8x1xf32> to vector<1x8x256xf32>
    %20 = arith.mulf %18, %19 : vector<1x8x256xf32>
    %21 = vector.broadcast %16 : vector<1x8x1xf32> to vector<1x8x256xf32>
    %22 = arith.addf %20, %21 : vector<1x8x256xf32>
    %c0_12 = arith.constant 0 : index
    %c0_13 = arith.constant 0 : index
    %c0_14 = arith.constant 0 : index
    %23 = vector.load %arg5[%c0_12, %c0_13, %c0_14] : memref<1x8x256xf32, #tpu.memory_space<vmem>>, vector<1x8x256xf32>
    tpu.vector_store %arg5[%c0_12, %c0_13, %c0_14], %22 {strides = array<i32>} : memref<1x8x256xf32, #tpu.memory_space<vmem>>, vector<1x8x256xf32>,
    return
  }
  func.func @transform_0(%arg0: i32, %arg1: i32) -> (i32, i32, i32) {
    %c0_i32 = arith.constant 0 : i32
    %c0_i32_0 = arith.constant 0 : i32
    return %arg0, %c0_i32, %arg1 : i32, i32, i32
  }
  func.func @transform_1(%arg0: i32, %arg1: i32) -> (i32, i32, i32) {
    %c0_i32 = arith.constant 0 : i32
    %c0_i32_0 = arith.constant 0 : i32
    %c0_i32_1 = arith.constant 0 : i32
    %c0_i32_2 = arith.constant 0 : i32
    return %c0_i32, %c0_i32_0, %c0_i32_1 : i32, i32, i32
  }
  func.func @transform_2(%arg0: i32, %arg1: i32) -> (i32, i32, i32) {
    %c0_i32 = arith.constant 0 : i32
    %c0_i32_0 = arith.constant 0 : i32
    %c0_i32_1 = arith.constant 0 : i32
    %c0_i32_2 = arith.constant 0 : i32
    return %c0_i32, %c0_i32_0, %c0_i32_1 : i32, i32, i32
  }
  func.func @transform_3(%arg0: i32, %arg1: i32) -> (i32, i32, i32) {
    %c0_i32 = arith.constant 0 : i32
    %c0_i32_0 = arith.constant 0 : i32
    return %arg0, %c0_i32, %arg1 : i32, i32, i32
  }
}

</mosaic_0001>

<bundles_post_ra>
// kernel: tpu_custom_call.1
= control target key start
LH: loop header
LB: loop body
LE: loop exit
PB: predicated region body
PF: predicated region fallthrough
CT: control target
= control target key end

     0   :  { %8 = vsyncpa [#allocation3], 0  ;;  %s734_s0 = inlined_call_operand.hbm [shape: f32[2,8,256], index: 0, kind: input, shape index: {}]   ;;  %s735_s1 = inlined_call_operand.vmem [shape: f32[1,8,1], index: 1, kind: input, shape index: {}]   ;;  %s736_s2 = inlined_call_operand.vmem [shape: f32[1,8,1], index: 2, kind: input, shape index: {}]   ;;  %s737_s3 = inlined_call_operand.hbm [shape: f32[2,8,256], index: 3, kind: output, shape index: {}]  }
   0x1   :  { %10 = vsyncpa [#allocation3 + $0x1], 0 }
   0x2   :  { %11 = vsyncpa [#allocation4], 0 }
   0x3   :  { %13 = vsyncpa [#allocation4 + $0x1], 0  ;;  %s584_s12 = smov 0   ;;  %s586_s13 = smov 0  }
   0x4   :  { %s588_s14 = smov 0   ;;  %s590_s15 = smov 0  }
   0x5   :  { %s592_s16 = smov 0   ;;  %s594_s17 = smov 0  }
   0x6 LB: > { %s366_s18 = sadd.s32 4294967295, %s559_s17   ;;  %s367_s19 = sadd.s32 4294967294, %s559_s17   ;;  %s559_s17 = sphi %s594_s17, %s19_s17   ;;  %s555_s16 = sphi %s592_s16, %s749_s16   ;;  %s551_s15 = sphi %s590_s15, %s748_s15   ;;  %s547_s14 = sphi %s588_s14, %s747_s14   ;;  %s543_s13 = sphi %s586_s13, %s746_s13   ;;  %s539_s12 = sphi %s584_s12, %s745_s12  }
   0x7   : > { %s31_s20 = sadd.s32 1, %s555_s16  ;;  %s40_s21 = sadd.s32 1, %s547_s14 }
   0x8   : > { %p33_p0 = scmp.ge.s32.totalorder %s31_s20, 2  ;;  %p47_p1 = scmp.ne.s32.totalorder %s547_s14, %s543_s13 }
   0x9   : > { %p48_p2 = scmp.eq.s32.totalorder %s559_s17, 0  ;;  %p53_p3 = scmp.ne.s32.totalorder %s543_s13, %s539_s12 }
   0xa   : > { %s751_s20 = smov (%p33_p0, %s31_s20), 0  ;;  %p54_p5 = scmp.eq.s32.totalorder %s366_s18, 0 }
   0xb   : > { %p625_p4 = por %p48_p2, %p47_p1  ;;  %s35_s23 = ssub.s32 %s555_s16, %s751_s20 }
   0xc   : > { %p121_p6 = scmp.eq.s32.totalorder %s366_s18, 1  ;;  %p38_p7 = scmp.eq.s32.totalorder %s35_s23, 0 }
   0xd   : > { %p631_p8 = por %p54_p5, %p53_p3  ;;  %p127_p10 = scmp.eq.s32.totalorder %s367_s19, 1 }
   0xe   : > { %p635_p9 = por %p121_p6, %p47_p1  ;;  %p395_p13 = scmp.lt.s32.totalorder %s559_s17, 2 }
   0xf   : > { %s640_s26 = scalar_select %p38_p7, %s547_s14, %s40_s21  }
  0x10   : > { %p642_p11 = por %p127_p10, %p53_p3  ;;  %s153_s28 = sand.u32 1, %s547_s14  }
  0x11   : > { %s370_s29 = sshll.u32 %s153_s28, 4  ;;  %s381_s30 = sshll.u32 %s555_s16, 8 }
  0x12   : > { %s741_s27 = scalar_select %p642_p11, 1, 0 }
  0x13   : > { %s165_s6 = scalar_lea.hbm %s734_s0, %s381_s30  ;;  %s157_s7 = scalar_lea.vmem [#allocation2], %s370_s29 }
  0x14   : > { %s167_s8 = sshll.u32 %s157_s7, 4  ;;  %p655_p0 = pnand %p395_p13, %p625_p4  ;;  %s168_s8 = int_to_ptr.vmem [resolvable:$true] %s167_s8 }
  0x15   : > { %p373_p1 = scmp.ge.s32.totalorder %s559_s17, 1  ;;  %p172_p2 = scmp.lt.s32.totalorder %s559_s17, 3 }
  0x16   : > { %s154_s10 = scalar_lea.sflag [#allocation3], %s153_s28  ;;  %p453_p3 = pneg %p655_p0 }
  0x17   : > { %s464_s11 = scalar_lea.vmem %s168_s8, 256  ;;  %s561_s18 = smov [#allocation2]  }
  0x18   : > { %p465_p5 = scmp.ne.s32.totalorder %s168_s8, %s464_s11  ;;  %s469_s19 = sshll.u32 %s561_s18, 4  ;;  %s470_s19 = int_to_ptr.vmem [resolvable:$false] %s469_s19 }
  0x19   : > { %s471_s21 = scalar_lea.vmem %s470_s19, 512  ;;  %p472_p10 = scmp.lt.s32.totalorder %s168_s8, %s470_s19 }
  0x1a   : > { %p467_p6 = pnand %p465_p5, %p453_p3  ;;  %p473_p12 = scmp.lt.s32.totalorder %s471_s21, %s464_s11 }
  0x1c   : > { %p468_p7 = pneg %p467_p6  ;;  %p474_p4 = por %p473_p12, %p472_p10 }
  0x1e   : > { %p475_p13 = pnand %p474_p4, %p468_p7 }
  0x20   : > { %478 = shalt.err (!%p475_p13)
}
  0x21   : > { %390 = dma.hbm_to_vmem [thread:$0]  (!%p655_p0), %s165_s6, 256, %s168_s8, %s154_s10  }
  0x22   : > { %p173_p11 = pnand %p373_p1, %p172_p2 }
  0x23   : > { %s670_s22 = sand.u32 (!%p173_p11), 1, %s543_s13  }
  0x24   : > { %176 = sbr.rel (%p173_p11) target bundleno = 187 (0xbb), region = 32  ;;  %s374_s23 = sshll.u32 (!%p173_p11), %s670_s22, 4 }
  0x25   : > { %s179_s28 = scalar_lea.sflag (!%p173_p11), [#allocation3], %s670_s22  ;;  %s182_s29 = scalar_lea.vmem (!%p173_p11), [#allocation2], %s374_s23 }
  0x29   : > { %530 = dma.done.wait (%p631_p8), %s179_s28, 256  }
  0x2a   : > { %532 = vsyncadd (%p631_p8), %s179_s28, 4294967040  ;;  %v562_v0 = vmov 0   ;;  %v245_v1 = vld [vmem:[%s735_s1] sm:$0xff]  ;;  %v208_v4 = vld [vmem:[%s182_s29 + $0x8] sm:$0xff]  ;;  %s382_s24 = sshll.u32 %s551_s15, 8  ;;  %s204_s7 = scalar_lea.vmem [#allocation5], %s374_s23 }
  0x2b   : > { %446 = vset.pattern.permute.xlu0 %v562_v0  ;;  %v246_v2 = vld [vmem:[%s736_s2] sm:$0xff]  ;;  %v215_v6 = vrot.slane %v208_v4, 4  ;;  %s282_s8 = sshll.u32 %s204_s7, 4  ;;  %s692_s11 = scalar_lea.hbm %s737_s3, %s382_s24  ;;  %s283_s8 = int_to_ptr.vmem [resolvable:$true] %s282_s8 }
  0x2c   : > { %251 = vperm.xlu0 %446, %v245_v1   ;;  %v207_v3 = vld [vmem:[%s182_s29] sm:$0xff]  ;;  %s266_s18 = scalar_lea.sflag [#allocation4], %s670_s22  ;;  %s479_s19 = scalar_lea.vmem %s283_s8, 256 }
  0x2d   : > { %v209_v5 = vrot.slane %v207_v3, 4  ;;  %v216_v8 = vadd.f32 %v215_v6, %v208_v4  ;;  %p480_p8 = scmp.ne.s32.totalorder %s283_s8, %s479_s19  ;;  %s563_s15 = smov [#allocation5]  }
  0x2e   : > { %s483_s21 = sshll.u32 %s563_s15, 4  ;;  %s484_s21 = int_to_ptr.vmem [resolvable:$false] %s483_s21 }
  0x2f   : > { %v210_v7 = vadd.f32 %v209_v5, %v207_v3  ;;  %v217_v10 = vrot.slane %v216_v8, 2  ;;  %p481_p11 = pnand %p480_p8, %p635_p9  ;;  %s485_s23 = scalar_lea.vmem %s484_s21, 512 }
  0x30   : > { %258 = vperm.xlu0 %446, %v246_v2   ;;  %p486_p0 = scmp.lt.s32.totalorder %s283_s8, %s484_s21  ;;  %p487_p1 = scmp.lt.s32.totalorder %s485_s23, %s479_s19 }
  0x31   : > { %v211_v9 = vrot.slane %v210_v7, 2  ;;  %v218_v12 = vadd.f32 %v217_v10, %v216_v8  ;;  %p482_p12 = pneg %p481_p11 }
  0x32   : > { %p488_p2 = por %p487_p1, %p486_p0 }
  0x33   : > { %v212_v11 = vadd.f32 %v211_v9, %v210_v7  ;;  %v219_v14 = vrot.slane %v218_v12, 1 }
  0x34   : > { %p489_p3 = pnand %p488_p2, %p482_p12 }
  0x35   : > { %v213_v13 = vrot.slane %v212_v11, 1  ;;  %v220_v16 = vadd.f32 %v219_v14, %v218_v12 }
  0x37   : > { %v214_v15 = vadd.f32 %v213_v13, %v212_v11  ;;  %v222_v18 = vmul.f32 0.125, %v220_v16 }
  0x39   : > { %v221_v17 = vmul.f32 0.125, %v214_v15  ;;  %v224_v20 = vsub.f32 %v208_v4, %v222_v18 }
  0x3b   : > { %v223_v19 = vsub.f32 %v207_v3, %v221_v17  ;;  %v226_v22 = vmul.f32 %v224_v20, %v224_v20 }
  0x3d   : > { %v225_v21 = vmul.f32 %v223_v19, %v223_v19  ;;  %v233_v24 = vrot.slane %v226_v22, 4 }
  0x3f   : > { %v227_v23 = vrot.slane %v225_v21, 4  ;;  %v234_v26 = vadd.f32 %v233_v24, %v226_v22 }
  0x41   : > { %v228_v25 = vadd.f32 %v227_v23, %v225_v21  ;;  %v235_v28 = vrot.slane %v234_v26, 2 }
  0x43   : > { %v229_v27 = vrot.slane %v228_v25, 2  ;;  %v236_v30 = vadd.f32 %v235_v28, %v234_v26 }
  0x45   : > { %v230_v29 = vadd.f32 %v229_v27, %v228_v25  ;;  %v237_v32 = vrot.slane %v236_v30, 1 }
  0x47   : > { %v231_v31 = vrot.slane %v230_v29, 1  ;;  %v238_v34 = vadd.f32 %v237_v32, %v236_v30 }
  0x49   : > { %v232_v33 = vadd.f32 %v231_v31, %v230_v29  ;;  %v240_v36 = vmul.f32 0.125, %v238_v34 }
  0x4b   : > { %v239_v35 = vmul.f32 0.125, %v232_v33  ;;  %v242_v38 = vadd.f32 1e-05, %v240_v36 }
  0x4d   : > { %v241_v37 = vadd.f32 1e-05, %v239_v35 }
  0x4f   : > { %447 = vrsqrt.f32 %v241_v37 }
  0x50   : > { %449 = vrsqrt.f32 %v242_v38 }
  0x5c   : > { %v448_v39 = vpop.eup %447 }
  0x5d   : > { %v450_v40 = vpop.eup %449  ;;  %v247_v41 = vmul.f32 %v448_v39, %v223_v19 }
  0x5e   : > { %v248_v42 = vmul.f32 %v450_v40, %v224_v20 }
  0xa7   : > { %v252_v43 = vpop.permute.xlu0 %251 }
  0xa8   : > { %v254_v44 = vmul.f32 %v252_v43, %v247_v41  ;;  %v255_v45 = vmul.f32 %v252_v43, %v248_v42 }
  0xab   : > { %v259_v46 = vpop.permute.xlu0 %258 }
  0xac   : > { %v261_v47 = vadd.f32 %v259_v46, %v254_v44  ;;  %v262_v48 = vadd.f32 %v259_v46, %v255_v45 }
  0xae   : > { %263 = vst [vmem:[%s204_s7] sm:$0xff] %v261_v47  ;;  %264 = vst [vmem:[%s204_s7 + $0x8] sm:$0xff] %v262_v48 }
  0xaf   : > { %492 = shalt.err (!%p489_p3)
}
  0xb0   : > { %s493_s28 = scalar_lea.hbm %s692_s11, 256  ;;  %s497_s30 = scalar_lea.hbm %s737_s3, 512 }
  0xb1   : > { %p494_p5 = scmp.ne.s32.totalorder %s692_s11, %s493_s28  ;;  %p498_p10 = scmp.lt.s32.totalorder %s692_s11, %s737_s3 }
  0xb2   : > { %p499_p4 = scmp.lt.s32.totalorder %s497_s30, %s493_s28 }
  0xb3   : > { %p495_p6 = pnand %p494_p5, %p635_p9 }
  0xb4   : > { %p500_p13 = por %p499_p4, %p498_p10 }
  0xb5   : > { %p496_p7 = pneg %p495_p6 }
  0xb7   : > { %p501_p8 = pnand %p500_p13, %p496_p7 }
  0xb9   : > { %504 = shalt.err (!%p501_p8)
}
  0xba   : > { %385 = dma.vmem_to_hbm [thread:$0]  (%p635_p9), %s283_s8, 256, %s692_s11, %s266_s18  }
  0xbb PF: > { %s294_s6 = sand.u32 1, %s539_s12   ;;  %p743_p11 = scmp.ne.s32.totalorder %s741_s27, 0 }
  0xbc   : > { %p744_p12 = scmp.ge.s32.totalorder %s559_s17, 2  ;;  %s295_s24 = scalar_lea.sflag [#allocation4], %s294_s6 }
  0xbe   : > { %p392_p0 = pnand %p744_p12, %p743_p11 }
  0xc0   : > { %p393_p1 = pneg %p392_p0 }
  0xc2   : > { %534 = dma.done.wait (%p393_p1), %s295_s24, 256  }
  0xc3   : > { %536 = vsyncadd (%p393_p1), %s295_s24, 4294967040  ;;  %s19_s17 = sadd.s32 1, %s559_s17   ;;  %s745_s12 = smov %s543_s13 }
  0xc4   : > { %p16_p2 = scmp.ge.s32.totalorder %s19_s17, 4   ;;  %s746_s13 = smov %s547_s14 }
  0xc5   : > { %s747_s14 = smov %s640_s26  ;;  %s748_s15 = smov %s555_s16 }
  0xc6   : > { %s749_s16 = smov %s751_s20  ;;  %18 = sbr.rel (!%p16_p2) target bundleno = 6 (0x6), region = 77 }
  0xcb   :  { %300 = vsyncpa [#allocation3], 1 }
  0xcc   :  { %302 = vsyncpa [#allocation3 + $0x1], 1 }
  0xcd   :  { %303 = vsyncpa [#allocation4], 1 }
  0xce   :  { %305 = vsyncpa [#allocation4 + $0x1], 1 }

</bundles_post_ra>
